<compile_context>
chip_gen: v5e
topology: v5e:2x2
jax: 0.10.0
libtpu: 0.0.40
codegen_flags: <defaults>
</compile_context>

<pallas_src>
import jax
import jax.numpy as jnp
from jax.experimental import pallas as pl
from jax.experimental.pallas import tpu as pltpu

_IN = 16 * 4 * 4      # 256 input features (already lane-aligned)
_H1, _H1P = 120, 128  # hidden 1, padded to 128 lanes
_H2, _H2P = 84, 128   # hidden 2, padded to 128 lanes
_NEG_BIG = -1e30      # softmax mask value for padded logit lanes


def _round_up(n, m):
    return ((n + m - 1) // m) * m


def _pad2(a, shape, fill=0.0):
    return jnp.pad(a, ((0, shape[0] - a.shape[0]), (0, shape[1] - a.shape[1])),
                   constant_values=fill)


def _mlp_softmax_kernel(x_ref, w1_ref, b1_ref, w2_ref, b2_ref, w3_ref, b3_ref,
                        o_ref):
    x = x_ref[...]                                                  # (TB, 256) bf16

    # Linear(256 -> 128pad) + ReLU   (bf16 MXU matmul, f32 accumulation)
    h1 = jnp.dot(x, w1_ref[...], preferred_element_type=jnp.float32)
    h1 = jnp.maximum(h1 + b1_ref[...], 0.0)                         # (TB, 128) f32

    # Linear(128pad -> 128pad) + ReLU (padded lanes stay exactly 0)
    h2 = jnp.dot(h1.astype(jnp.bfloat16), w2_ref[...],
                 preferred_element_type=jnp.float32)
    h2 = jnp.maximum(h2 + b2_ref[...], 0.0)                         # (TB, 128) f32

    # Linear(128pad -> Npad); padded logit lanes get -1e30 bias.
    logits = jnp.dot(h2.astype(jnp.bfloat16), w3_ref[...],
                     preferred_element_type=jnp.float32)
    logits = logits + b3_ref[...]                                   # (TB, Npad)

    # Numerically stable softmax over the lane dim; padded lanes -> exp() == 0.
    m = jnp.max(logits, axis=-1, keepdims=True)
    e = jnp.exp(logits - m)
    denom = jnp.sum(e, axis=-1, keepdims=True)
    o_ref[...] = e * pl.reciprocal(denom, approx=False)


def mnist_classifier_forward(x, params, with_softmax=True):
    """Runs the fused Pallas kernel.  x: (B, 256) float32."""
    # TODO(synk): with_softmax=False variant would need a logits-only kernel;
    # only the default with_softmax=True is implemented here.
    assert with_softmax, "only with_softmax=True is implemented in the kernel"
    w1, b1, w2, b2, w3, b3 = params
    B = x.shape[0]
    N = w3.shape[1]
    NP = _round_up(N, 128)

    # ---- parameter prep: lane-pad + cast to bf16 (biases stay f32) ----
    w1p = _pad2(w1, (_IN, _H1P)).astype(jnp.bfloat16)
    w2p = _pad2(w2, (_H1P, _H2P)).astype(jnp.bfloat16)
    w3p = _pad2(w3, (_H2P, NP)).astype(jnp.bfloat16)
    b1p = _pad2(b1, (1, _H1P)).astype(jnp.float32)
    b2p = _pad2(b2, (1, _H2P)).astype(jnp.float32)
    b3p = _pad2(b3.astype(jnp.float32), (1, NP), fill=_NEG_BIG)

    # ---- batch tiling: TB rows per grid step, batch padded to a tile multiple ----
    TB = min(512, _round_up(max(B, 8), 8))
    B_pad = _round_up(B, TB)
    xp = jnp.zeros((B_pad, _IN), jnp.bfloat16).at[:B].set(x.astype(jnp.bfloat16))

    out = pl.pallas_call(
        _mlp_softmax_kernel,
        out_shape=jax.ShapeDtypeStruct((B_pad, NP), jnp.float32),
        grid=(B_pad // TB,),
        in_specs=[
            pl.BlockSpec((TB, _IN), lambda i: (i, 0)),       # x tile (pipelined)
            pl.BlockSpec((_IN, _H1P), lambda i: (0, 0)),     # W1 (resident)
            pl.BlockSpec((1, _H1P), lambda i: (0, 0)),       # b1
            pl.BlockSpec((_H1P, _H2P), lambda i: (0, 0)),    # W2
            pl.BlockSpec((1, _H2P), lambda i: (0, 0)),       # b2
            pl.BlockSpec((_H2P, NP), lambda i: (0, 0)),      # W3
            pl.BlockSpec((1, NP), lambda i: (0, 0)),         # b3 (masked pad)
        ],
        out_specs=pl.BlockSpec((TB, NP), lambda i: (i, 0)),
        compiler_params=pltpu.CompilerParams(
            dimension_semantics=("parallel",)),
    )(xp, w1p, b1p, w2p, b2p, w3p, b3p)

    out = out[:B, :N]
    # PyTorch .squeeze(0): only drops the leading dim when it is size 1.
    if out.shape[0] == 1:
        out = out[0]
    return out


def init_params(key, n_classes=10):
    """Deterministic synthetic parameters matching nn.Linear shapes.

    Stored as (in, out) / (1, out) so the kernel computes x @ W + b.
    """
    dims = [(_IN, _H1), (_H1, _H2), (_H2, n_classes)]
    params = []
    for (fan_in, fan_out) in dims:
        key, kw, kb = jax.random.split(key, 3)
        bound = 1.0 / jnp.sqrt(fan_in)           # PyTorch default init range
        w = jax.random.uniform(kw, (fan_in, fan_out), jnp.float32,
                               minval=-bound, maxval=bound)
        b = jax.random.uniform(kb, (1, fan_out), jnp.float32,
                               minval=-bound, maxval=bound)
        params.extend([w, b])
    return tuple(params)


def reference_forward(x, params):
    """Plain-JAX reference using the same bf16-input / f32-accumulate math."""
    w1, b1, w2, b2, w3, b3 = params
    xb = x.astype(jnp.bfloat16)
    h1 = jnp.maximum(
        jnp.dot(xb, w1.astype(jnp.bfloat16),
                preferred_element_type=jnp.float32) + b1, 0.0)
    h2 = jnp.maximum(
        jnp.dot(h1.astype(jnp.bfloat16), w2.astype(jnp.bfloat16),
                preferred_element_type=jnp.float32) + b2, 0.0)
    logits = jnp.dot(h2.astype(jnp.bfloat16), w3.astype(jnp.bfloat16),
                     preferred_element_type=jnp.float32) + b3
    out = jax.nn.softmax(logits, axis=1)
    if out.shape[0] == 1:
        out = out[0]
    return out


if __name__ == "__main__":
    key = jax.random.PRNGKey(0)
    key, kx, kx2 = jax.random.split(key, 3)

    B, N = 2, 10
    # Input: flattened (16, 4, 4) NCHW feature map per example -> (B, 256).
    x = jax.random.normal(kx, (B, _IN), dtype=jnp.float32)
    params = init_params(key, n_classes=N)

    out = jax.block_until_ready(mnist_classifier_forward(x, params))
    ref = reference_forward(x, params)
    assert out.shape == ref.shape
    assert jnp.allclose(out, ref, atol=1e-4, rtol=1e-4), (
        f"max abs err {jnp.max(jnp.abs(out - ref))}")
    assert jnp.allclose(jnp.sum(out, axis=-1), 1.0, atol=1e-4)

    # Larger batch: exercises the multi-tile grid + batch padding path.
    B2 = 600
    x2 = jax.random.normal(kx2, (B2, _IN), dtype=jnp.float32)
    out2 = jax.block_until_ready(mnist_classifier_forward(x2, params))
    ref2 = reference_forward(x2, params)
    assert out2.shape == ref2.shape
    assert jnp.allclose(out2, ref2, atol=1e-4, rtol=1e-4), (
        f"max abs err {jnp.max(jnp.abs(out2 - ref2))}")
    assert jnp.allclose(jnp.sum(out2, axis=-1), 1.0, atol=1e-4)

    print("KERNEL_OK")
</pallas_src>

<mosaic_0001>
module attributes {stable_mosaic.version = 11 : i64} {
  func.func @_mlp_softmax_kernel(%arg0: i32, %arg1: memref<8x256xbf16, #tpu.memory_space<vmem>>, %arg2: memref<256x128xbf16, #tpu.memory_space<vmem>>, %arg3: memref<1x128xf32, #tpu.memory_space<vmem>>, %arg4: memref<128x128xbf16, #tpu.memory_space<vmem>>, %arg5: memref<1x128xf32, #tpu.memory_space<vmem>>, %arg6: memref<128x128xbf16, #tpu.memory_space<vmem>>, %arg7: memref<1x128xf32, #tpu.memory_space<vmem>>, %arg8: memref<8x128xf32, #tpu.memory_space<vmem>>) attributes {dimension_semantics = [#tpu.dimension_semantics<parallel>], iteration_bounds = array<i64: 1>, scalar_prefetch = 0 : i64, scratch_operands = 0 : i64, tpu.core_type = #tpu.core_type<tc>, window_params = [{transform_indices = @transform_0, window_bounds = array<i64: 8, 256>}, {pipeline_mode = #tpu.pipeline_mode<synchronous>, transform_indices = @transform_1, window_bounds = array<i64: 256, 128>}, {pipeline_mode = #tpu.pipeline_mode<synchronous>, transform_indices = @transform_2, window_bounds = array<i64: 1, 128>}, {pipeline_mode = #tpu.pipeline_mode<synchronous>, transform_indices = @transform_3, window_bounds = array<i64: 128, 128>}, {pipeline_mode = #tpu.pipeline_mode<synchronous>, transform_indices = @transform_4, window_bounds = array<i64: 1, 128>}, {pipeline_mode = #tpu.pipeline_mode<synchronous>, transform_indices = @transform_5, window_bounds = array<i64: 128, 128>}, {pipeline_mode = #tpu.pipeline_mode<synchronous>, transform_indices = @transform_6, window_bounds = array<i64: 1, 128>}, {transform_indices = @transform_7, window_bounds = array<i64: 8, 128>}]} {
    %c0 = arith.constant 0 : index
    %c0_0 = arith.constant 0 : index
    %0 = vector.load %arg1[%c0, %c0_0] : memref<8x256xbf16, #tpu.memory_space<vmem>>, vector<8x256xbf16>
    %c0_1 = arith.constant 0 : index
    %c0_2 = arith.constant 0 : index
    %1 = vector.load %arg2[%c0_1, %c0_2] : memref<256x128xbf16, #tpu.memory_space<vmem>>, vector<256x128xbf16>
    %cst = arith.constant dense<0.000000e+00> : vector<8x128xf32>
    %2 = tpu.matmul %0, %1, %cst {dimension_numbers = #tpu.dot_dimension_numbers<[1], [0], [0], [1], [0, 0, 1, 1], [], []>} : vector<8x256xbf16>, vector<256x128xbf16>, vector<8x128xf32> -> vector<8x128xf32>
    %c0_3 = arith.constant 0 : index
    %c0_4 = arith.constant 0 : index
    %3 = vector.load %arg3[%c0_3, %c0_4] : memref<1x128xf32, #tpu.memory_space<vmem>>, vector<1x128xf32>
    %4 = vector.broadcast %3 : vector<1x128xf32> to vector<8x128xf32>
    %5 = arith.addf %2, %4 : vector<8x128xf32>
    %cst_5 = arith.constant 0.000000e+00 : f32
    %6 = vector.broadcast %cst_5 : f32 to vector<8x128xf32>
    %7 = arith.maximumf %5, %6 : vector<8x128xf32>
    %8 = arith.truncf %7 : vector<8x128xf32> to vector<8x128xbf16>
    %c0_6 = arith.constant 0 : index
    %c0_7 = arith.constant 0 : index
    %9 = vector.load %arg4[%c0_6, %c0_7] : memref<128x128xbf16, #tpu.memory_space<vmem>>, vector<128x128xbf16>
    %cst_8 = arith.constant dense<0.000000e+00> : vector<8x128xf32>
    %10 = tpu.matmul %8, %9, %cst_8 {dimension_numbers = #tpu.dot_dimension_numbers<[1], [0], [0], [1], [0, 0, 1, 1], [], []>} : vector<8x128xbf16>, vector<128x128xbf16>, vector<8x128xf32> -> vector<8x128xf32>
    %c0_9 = arith.constant 0 : index
    %c0_10 = arith.constant 0 : index
    %11 = vector.load %arg5[%c0_9, %c0_10] : memref<1x128xf32, #tpu.memory_space<vmem>>, vector<1x128xf32>
    %12 = vector.broadcast %11 : vector<1x128xf32> to vector<8x128xf32>
    %13 = arith.addf %10, %12 : vector<8x128xf32>
    %cst_11 = arith.constant 0.000000e+00 : f32
    %14 = vector.broadcast %cst_11 : f32 to vector<8x128xf32>
    %15 = arith.maximumf %13, %14 : vector<8x128xf32>
    %16 = arith.truncf %15 : vector<8x128xf32> to vector<8x128xbf16>
    %c0_12 = arith.constant 0 : index
    %c0_13 = arith.constant 0 : index
    %17 = vector.load %arg6[%c0_12, %c0_13] : memref<128x128xbf16, #tpu.memory_space<vmem>>, vector<128x128xbf16>
    %cst_14 = arith.constant dense<0.000000e+00> : vector<8x128xf32>
    %18 = tpu.matmul %16, %17, %cst_14 {dimension_numbers = #tpu.dot_dimension_numbers<[1], [0], [0], [1], [0, 0, 1, 1], [], []>} : vector<8x128xbf16>, vector<128x128xbf16>, vector<8x128xf32> -> vector<8x128xf32>
    %c0_15 = arith.constant 0 : index
    %c0_16 = arith.constant 0 : index
    %19 = vector.load %arg7[%c0_15, %c0_16] : memref<1x128xf32, #tpu.memory_space<vmem>>, vector<1x128xf32>
    %20 = vector.broadcast %19 : vector<1x128xf32> to vector<8x128xf32>
    %21 = arith.addf %18, %20 : vector<8x128xf32>
    %cst_17 = arith.constant dense<0xFF800000> : vector<8xf32>
    %22 = vector.multi_reduction <maximumf>, %21, %cst_17 [1] : vector<8x128xf32> to vector<8xf32>
    %23 = vector.shape_cast %22 : vector<8xf32> to vector<8x1xf32>
    %24 = vector.broadcast %23 : vector<8x1xf32> to vector<8x128xf32>
    %25 = arith.subf %21, %24 : vector<8x128xf32>
    %26 = math.exp %25 : vector<8x128xf32>
    %cst_18 = arith.constant dense<0.000000e+00> : vector<8xf32>
    %27 = vector.multi_reduction <add>, %26, %cst_18 [1] : vector<8x128xf32> to vector<8xf32>
    %28 = vector.shape_cast %27 : vector<8xf32> to vector<8x1xf32>
    %29 = tpu.reciprocal %28 : vector<8x1xf32> -> vector<8x1xf32>
    %30 = vector.broadcast %29 : vector<8x1xf32> to vector<8x128xf32>
    %31 = arith.mulf %26, %30 : vector<8x128xf32>
    %c0_19 = arith.constant 0 : index
    %c0_20 = arith.constant 0 : index
    %32 = vector.load %arg8[%c0_19, %c0_20] : memref<8x128xf32, #tpu.memory_space<vmem>>, vector<8x128xf32>
    tpu.vector_store %arg8[%c0_19, %c0_20], %31 {strides = array<i32>} : memref<8x128xf32, #tpu.memory_space<vmem>>, vector<8x128xf32>,
    return
  }
  func.func @transform_0(%arg0: i32) -> (i32, i32) {
    %c0_i32 = arith.constant 0 : i32
    %c0_i32_0 = arith.constant 0 : i32
    return %arg0, %c0_i32 : i32, i32
  }
  func.func @transform_1(%arg0: i32) -> (i32, i32) {
    %c0_i32 = arith.constant 0 : i32
    %c0_i32_0 = arith.constant 0 : i32
    %c0_i32_1 = arith.constant 0 : i32
    return %c0_i32, %c0_i32_0 : i32, i32
  }
  func.func @transform_2(%arg0: i32) -> (i32, i32) {
    %c0_i32 = arith.constant 0 : i32
    %c0_i32_0 = arith.constant 0 : i32
    %c0_i32_1 = arith.constant 0 : i32
    return %c0_i32, %c0_i32_0 : i32, i32
  }
  func.func @transform_3(%arg0: i32) -> (i32, i32) {
    %c0_i32 = arith.constant 0 : i32
    %c0_i32_0 = arith.constant 0 : i32
    %c0_i32_1 = arith.constant 0 : i32
    return %c0_i32, %c0_i32_0 : i32, i32
  }
  func.func @transform_4(%arg0: i32) -> (i32, i32) {
    %c0_i32 = arith.constant 0 : i32
    %c0_i32_0 = arith.constant 0 : i32
    %c0_i32_1 = arith.constant 0 : i32
    return %c0_i32, %c0_i32_0 : i32, i32
  }
  func.func @transform_5(%arg0: i32) -> (i32, i32) {
    %c0_i32 = arith.constant 0 : i32
    %c0_i32_0 = arith.constant 0 : i32
    %c0_i32_1 = arith.constant 0 : i32
    return %c0_i32, %c0_i32_0 : i32, i32
  }
  func.func @transform_6(%arg0: i32) -> (i32, i32) {
    %c0_i32 = arith.constant 0 : i32
    %c0_i32_0 = arith.constant 0 : i32
    %c0_i32_1 = arith.constant 0 : i32
    return %c0_i32, %c0_i32_0 : i32, i32
  }
  func.func @transform_7(%arg0: i32) -> (i32, i32) {
    %c0_i32 = arith.constant 0 : i32
    %c0_i32_0 = arith.constant 0 : i32
    return %arg0, %c0_i32 : i32, i32
  }
}

</mosaic_0001>

<bundles_post_ra>
// kernel: tpu_custom_call.1
= control target key start
LH: loop header
LB: loop body
LE: loop exit
PB: predicated region body
PF: predicated region fallthrough
CT: control target
= control target key end

     0   :  { %12 = vsyncpa [#allocation3], 0  ;;  %s835_s0 = inlined_call_operand.hbm [shape: bf16[8,256], index: 0, kind: input, shape index: {}]   ;;  %s836_s1 = inlined_call_operand.hbm [shape: bf16[256,128], index: 1, kind: input, shape index: {}]   ;;  %s837_s2 = inlined_call_operand.vmem [shape: f32[1,128], index: 2, kind: input, shape index: {}]   ;;  %s838_s3 = inlined_call_operand.hbm [shape: bf16[128,128], index: 3, kind: input, shape index: {}]   ;;  %s839_s4 = inlined_call_operand.vmem [shape: f32[1,128], index: 4, kind: input, shape index: {}]   ;;  %s840_s5 = inlined_call_operand.hbm [shape: bf16[128,128], index: 5, kind: input, shape index: {}]   ;;  %s841_s6 = inlined_call_operand.vmem [shape: f32[1,128], index: 6, kind: input, shape index: {}]   ;;  %s842_s7 = inlined_call_operand.hbm [shape: f32[8,128], index: 7, kind: output, shape index: {}]  }
   0x1   :  { %13 = vsyncpa [#allocation6], 0 }
   0x2   :  { %14 = vsyncpa [#allocation9], 0  ;;  %s31_s26 = sshll.u32 %s836_s1, 4  ;;  %s32_s26 = int_to_ptr.hbm [resolvable:$true] %s31_s26 }
   0x3   :  { %15 = vsyncpa [#allocation4], 0  ;;  %s764_s27 = smov [#allocation5]   ;;  %s21_s8 = sshll.u32 %s835_s0, 4  ;;  %s22_s8 = int_to_ptr.hbm [resolvable:$true] %s21_s8 }
   0x4   :  { %s33_s28 = sshll.u32 %s764_s27, 4  ;;  %s765_s9 = smov 64   ;;  %s34_s28 = int_to_ptr.vmem [resolvable:$true] %s33_s28 }
   0x5   :  { %s766_s10 = smov 4   ;;  %s767_s11 = smov [#allocation2]  }
   0x6   :  { %39 = dma.hbm_to_vmem [thread:$0]  %s32_s26, 2048, %s34_s28, [#allocation6], %s765_s9, %s765_s9, %s766_s10  }
   0x7   :  { %s23_s12 = sshll.u32 %s767_s11, 4  ;;  %s46_s15 = sshll.u32 %s838_s3, 4  ;;  %s24_s12 = int_to_ptr.vmem [resolvable:$true] %s23_s12  ;;  %s47_s15 = int_to_ptr.hbm [resolvable:$true] %s46_s15 }
   0x8   :  { %26 = dma.hbm_to_vmem [thread:$0]  %s22_s8, 128, %s24_s12, [#allocation3]  }
   0x9   :  { %s61_s17 = sshll.u32 %s840_s5, 4  ;;  %s768_s18 = smov [#allocation7]   ;;  %s62_s17 = int_to_ptr.hbm [resolvable:$true] %s61_s17 }
   0xa   :  { %s48_s19 = sshll.u32 %s768_s18, 4  ;;  %s769_s0 = smov [#allocation8]   ;;  %s49_s19 = int_to_ptr.vmem [resolvable:$true] %s48_s19 }
   0xb   :  { %54 = dma.hbm_to_vmem [thread:$0]  %s47_s15, 1024, %s49_s19, [#allocation6], %s765_s9, %s765_s9, %s766_s10  }
   0xc   :  { %s63_s20 = sshll.u32 %s769_s0, 4  ;;  %s64_s20 = int_to_ptr.vmem [resolvable:$true] %s63_s20 }
   0xd   :  { %69 = dma.hbm_to_vmem [thread:$0]  %s62_s17, 1024, %s64_s20, [#allocation9], %s765_s9, %s765_s9, %s766_s10  }
   0xe   :  { %756 = dma.done.wait [#allocation3], 128  }
   0xf   :  { %757 = vsyncadd [#allocation3], 4294967168 }
  0x10   :  { %758 = dma.done.wait [#allocation6], 3072  }
  0x11   :  { %759 = vsyncadd [#allocation6], 4294964224 }
  0x12   :  { %760 = dma.done.wait [#allocation9], 1024  }
  0x13   :  { %761 = vsyncadd [#allocation9], 4294966272  ;;  %v597_v0 = vld [vmem:[#allocation5 + $0x38] sm:$0xff]  ;;  %v596_v2 = vld [vmem:[#allocation5 + $0x30] sm:$0xff]  ;;  %s450_s26 = sshll.u32 %s842_s7, 4  ;;  %s451_s26 = int_to_ptr.hbm [resolvable:$true] %s450_s26 }
  0x14   :  { %v605_v1 = vld [vmem:[#allocation5 + $0x78] sm:$0xff]  ;;  %228 = vmatpush.bf16.msra.mxu0 %v597_v0  ;;  %v604_v3 = vld [vmem:[#allocation5 + $0x70] sm:$0xff]  ;;  %v595_v5 = vld [vmem:[#allocation5 + $0x28] sm:$0xff] }
  0x15   :  { %241 = vmatpush.bf16.msra.mxu1 %v605_v1  ;;  %v613_v4 = vld [vmem:[#allocation7 + $0x38] sm:$0xff]  ;;  %v603_v6 = vld [vmem:[#allocation5 + $0x68] sm:$0xff]  ;;  %v612_v7 = vld [vmem:[#allocation7 + $0x30] sm:$0xff] }
  0x16   :  { %324 = vmatpush.bf16.msra.mxu2 %v613_v4  ;;  %v594_v8 = vld [vmem:[#allocation5 + $0x20] sm:$0xff]  ;;  %v611_v10 = vld [vmem:[#allocation7 + $0x28] sm:$0xff]  ;;  %v593_v11 = vld [vmem:[#allocation5 + $0x18] sm:$0xff] }
  0x17   :  { %v602_v9 = vld [vmem:[#allocation5 + $0x60] sm:$0xff]  ;;  %v601_v12 = vld [vmem:[#allocation5 + $0x58] sm:$0xff]  ;;  %v592_v14 = vld [vmem:[#allocation5 + $0x10] sm:$0xff] }
  0x18   :  { %229 = vmatpush.bf16.msra.mxu0 %v596_v2  ;;  %v610_v13 = vld [vmem:[#allocation7 + $0x20] sm:$0xff]  ;;  %v600_v15 = vld [vmem:[#allocation5 + $0x50] sm:$0xff]  ;;  %v609_v16 = vld [vmem:[#allocation7 + $0x18] sm:$0xff] }
  0x19   :  { %242 = vmatpush.bf16.msra.mxu1 %v604_v3  ;;  %v591_v17 = vld [vmem:[#allocation5 + $0x8] sm:$0xff]  ;;  %v88_v19 = vld [vmem:[#allocation2] sm:$0xff]  ;;  %v608_v20 = vld [vmem:[#allocation7 + $0x10] sm:$0xff] }
  0x1a   :  { %325 = vmatpush.bf16.msra.mxu2 %v612_v7  ;;  %v599_v18 = vld [vmem:[#allocation5 + $0x48] sm:$0xff]  ;;  %v126_v21 = vunpack.c.l.b16 %v88_v19  ;;  %v127_v22 = vunpack.c.h.b16 %v88_v19  ;;  %v590_v23 = vld [vmem:[#allocation5] sm:$0xff]  ;;  %v621_v29 = vld [vmem:[#allocation8 + $0x38] sm:$0xff] }
  0x1b   :  { %v598_v24 = vld [vmem:[#allocation5 + $0x40] sm:$0xff]  ;;  %v607_v27 = vld [vmem:[#allocation7 + $0x8] sm:$0xff]  ;;  %407 = vmatpush.bf16.msra.mxu3 %v621_v29  ;;  %v620_v30 = vld [vmem:[#allocation8 + $0x30] sm:$0xff] }
  0x1c   :  { %230 = vmatpush.bf16.msra.mxu0 %v595_v5  ;;  %v128_v25 = vpack.c.b16 %v126_v21, %v126_v21  ;;  %v129_v26 = vpack.c.b16 %v127_v22, %v127_v22  ;;  %v606_v28 = vld [vmem:[#allocation7] sm:$0xff]  ;;  %v619_v31 = vld [vmem:[#allocation8 + $0x28] sm:$0xff]  ;;  %v617_v33 = vld [vmem:[#allocation8 + $0x18] sm:$0xff] }
  0x1d   :  { %243 = vmatpush.bf16.msra.mxu1 %v603_v6  ;;  %v618_v32 = vld [vmem:[#allocation8 + $0x20] sm:$0xff]  ;;  %v616_v34 = vld [vmem:[#allocation8 + $0x10] sm:$0xff]  ;;  %v629_v35 = vld [vmem:[%s837_s2] ss:$0 sm:$0xff] }
  0x1e   :  { %326 = vmatpush.bf16.msra.mxu2 %v611_v10  ;;  %v615_v44 = vld [vmem:[#allocation8 + $0x8] sm:$0xff]  ;;  %v614_v45 = vld [vmem:[#allocation8] sm:$0xff]  ;;  %v630_v46 = vld [vmem:[%s839_s4] ss:$0 sm:$0xff]  ;;  %s770_s4 = smov [#allocation10]  }
  0x1f   :  { %408 = vmatpush.bf16.msra.mxu3 %v620_v30  ;;  %v631_v52 = vld [vmem:[%s841_s6] ss:$0 sm:$0xff]  ;;  %s448_s6 = sshll.u32 %s770_s4, 4  ;;  %s449_s6 = int_to_ptr.vmem [resolvable:$true] %s448_s6 }
  0x20   :  { %231 = vmatpush.bf16.msra.mxu0 %v594_v8 }
  0x21   :  { %244 = vmatpush.bf16.msra.mxu1 %v602_v9 }
  0x22   :  { %327 = vmatpush.bf16.msra.mxu2 %v610_v13 }
  0x23   :  { %409 = vmatpush.bf16.msra.mxu3 %v619_v31 }
  0x24   :  { %232 = vmatpush.bf16.msra.mxu0 %v593_v11 }
  0x25   :  { %245 = vmatpush.bf16.msra.mxu1 %v601_v12 }
  0x26   :  { %328 = vmatpush.bf16.msra.mxu2 %v609_v16 }
  0x27   :  { %410 = vmatpush.bf16.msra.mxu3 %v618_v32 }
  0x28   :  { %233 = vmatpush.bf16.msra.mxu0 %v592_v14 }
  0x29   :  { %246 = vmatpush.bf16.msra.mxu1 %v600_v15 }
  0x2a   :  { %329 = vmatpush.bf16.msra.mxu2 %v608_v20 }
  0x2b   :  { %411 = vmatpush.bf16.msra.mxu3 %v617_v33 }
  0x2c   :  { %234 = vmatpush.bf16.msra.mxu0 %v591_v17 }
  0x2d   :  { %247 = vmatpush.bf16.msra.mxu1 %v599_v18 }
  0x2e   :  { %330 = vmatpush.bf16.msra.mxu2 %v607_v27 }
  0x2f   :  { %412 = vmatpush.bf16.msra.mxu3 %v616_v34 }
  0x30   :  { %235 = vmatpush.bf16.msra.mxu0 %v590_v23 }
  0x31   :  { %248 = vmatpush.bf16.msra.mxu1 %v598_v24 }
  0x32   :  { %331 = vmatpush.bf16.msra.mxu2 %v606_v28 }
  0x33   :  { %236 = vmatmul.bf16.vlgmr.msra.gmra.mxu0 %v128_v25  ;;  %413 = vmatpush.bf16.msra.mxu3 %v615_v44 }
  0x34   :  { %249 = vmatmul.bf16.vlgmr.msra.gmra.mxu1 %v129_v26 }
  0x37   :  { %414 = vmatpush.bf16.msra.mxu3 %v614_v45 }
  0xb0   :  { %v237_v36 = vpop.f32.mrf.mxu0 }
  0xb1   :  { %v250_v37 = vpop.f32.mrf.mxu1  ;;  %v238_v38 = vadd.f32 %v629_v35, %v237_v36 }
  0xb3   :  { %v251_v39 = vadd.f32 %v250_v37, %v238_v38 }
  0xb5   :  { %v254_v40 = vmax.f32 %v251_v39, 0.0 }
  0xb7   :  { %v255_v41 = vpack.c.bf16 %v254_v40, %v254_v40 }
  0xb8   :  { %v239_v42 = vpop.f32.mrf.mxu0 }
  0xb9   :  { %v252_v43 = vpop.f32.mrf.mxu1  ;;  %332 = vmatmul.bf16.vlgmr.msra.gmra.mxu2 %v255_v41 }
 0x13c   :  { %v333_v47 = vpop.f32.mrf.mxu2 }
 0x13d   :  { %v334_v48 = vadd.f32 %v630_v46, %v333_v47 }
 0x13f   :  { %v337_v49 = vmax.f32 %v334_v48, 0.0 }
 0x141   :  { %v338_v50 = vpack.c.bf16 %v337_v49, %v337_v49 }
 0x143   :  { %415 = vmatmul.bf16.vlgmr.msra.gmra.mxu3 %v338_v50 }
 0x144   :  { %v335_v51 = vpop.f32.mrf.mxu2 }
 0x1c6   :  { %v416_v53 = vpop.f32.mrf.mxu3 }
 0x1c7   :  { %v417_v54 = vadd.f32 %v631_v52, %v416_v53 }
 0x1c9   :  { %420 = vmax.xlane.f32.xlu0 %v417_v54 }
 0x1ce   :  { %v418_v55 = vpop.f32.mrf.mxu3 }
 0x23c   :  { %v421_v56 = vpop.xlane.xlu0 %420 }
 0x23d   :  { %v422_v57 = vsub.f32 %v417_v54, %v421_v56 }
 0x23f   :  { %v423_v58 = vmul.f32 1.442695, %v422_v57 }
 0x241   :  { %632 = vpow2.f32 %v423_v58 }
 0x247   :  { %v633_v59 = vpop.eup %632 }
 0x248   :  { %425 = vadd.xlane.f32.xlu0 %v633_v59 }
 0x2bb   :  { %v426_v60 = vpop.xlane.xlu0 %425 }
 0x2bc   :  { %634 = vrcp.f32 %v426_v60  ;;  %v438_v0 = vand.u32 2147483648, %v426_v60  ;;  %v436_v2 = vand.u32 2147483647, %v426_v60  ;;  %vm432_vm1 = vweird.f32 %v426_v60 }
 0x2be   :  { %v439_v4 = vor.u32 1.1754944e-38, %v438_v0  ;;  %vm437_vm3 = vcmp.eq.f32.partialorder %v436_v2, 8.507059e+37 }
 0x2c2   :  { %v635_v61 = vpop.eup %634 }
 0x2c3   :  { %v428_v62 = vmul.f32 %v635_v61, %v426_v60  ;;  %vm433_vm0 = vweird.f32 %v635_v61 }
 0x2c4   :  { %vm434_vm2 = vmor %vm432_vm1, %vm433_vm0 }
 0x2c5   :  { %v429_v63 = vsub.f32 1.0, %v428_v62 }
 0x2c7   :  { %v430_v1 = vmul.f32 %v635_v61, %v429_v63 }
 0x2c9   :  { %v431_v3 = vadd.f32 %v635_v61, %v430_v1 }
 0x2cb   :  { %v435_v5 = vsel %vm434_vm2, %v635_v61, %v431_v3 }
 0x2cc   :  { %v440_v6 = vsel %vm437_vm3, %v439_v4, %v435_v5 }
 0x2cd   :  { %v441_v7 = vmul.f32 %v633_v59, %v440_v6 }
 0x2cf   :  { %442 = vst [vmem:[#allocation10] sm:$0xff] %v441_v7 }
 0x2d0   :  { %453 = dma.vmem_to_hbm [thread:$0]  %s449_s6, 128, %s451_s26, [#allocation4]  }
 0x2d1   :  { %762 = dma.done.wait [#allocation4], 128  }
 0x2d2   :  { %763 = vsyncadd [#allocation4], 4294967168 }
 0x2d3   :  { %458 = vsyncpa [#allocation3], 1 }
 0x2d4   :  { %459 = vsyncpa [#allocation6], 1 }
 0x2d5   :  { %460 = vsyncpa [#allocation9], 1 }
 0x2d6   :  { %461 = vsyncpa [#allocation4], 1 }

</bundles_post_ra>
